<compile_context>
chip_gen: v6e
topology: v6e:2x2x1
jax: 0.10.0
libtpu: 0.0.40
codegen_flags: <defaults>
</compile_context>

<pallas_src>
import jax
import jax.numpy as jnp
from jax.experimental import pallas as pl
from jax.experimental.pallas import tpu as pltpu


def mlp3out_kernel(x_ref, w1_ref, b1_ref, wh_ref, bh_ref, out_ref):
    # fc1 + ReLU: bf16 operands on the MXU, f32 accumulate; bias + ReLU in f32 (VPU).
    h = jnp.dot(x_ref[...], w1_ref[...], preferred_element_type=jnp.float32)
    h = jnp.maximum(h + b1_ref[...], 0.0)
    # Fused heads: single MXU push over the lane-padded [hidden, head_pad] slab,
    # single lane-dense (multiple-of-128) output store.
    y = jnp.dot(h.astype(wh_ref.dtype), wh_ref[...],
                preferred_element_type=jnp.float32)
    out_ref[...] = (y + bh_ref[...]).astype(out_ref.dtype)


def _round_up(n, m):
    return ((n + m - 1) // m) * m


def _default_batch_tile(batch, sublane):
    """Largest divisor of `batch` that is a multiple of `sublane`, <= 512 and
    gives at least 2 grid steps (so x/output DMAs pipeline against compute and
    the 'parallel' batch axis can shard across v7x's 2 TensorCores).
    Falls back to a single grid step for tiny batches."""
    best = None
    cand = sublane
    limit = min(batch // 2, 512)
    while cand <= limit:
        if batch % cand == 0:
            best = cand
        cand += sublane
    return best if best is not None else batch


def mlp3out_forward(x, params, *, batch_tile=None, compute_dtype=jnp.bfloat16):
    """x: [B, input_dim] float32. params: dict of pre-transposed weights/biases.

    Returns (out_cls [B,2], out_rec [B,output_dim], out_app [B,output_dim]).
    """
    B, input_dim = x.shape
    hidden_dim = params["w1"].shape[1]
    output_dim = params["wr"].shape[1]

    head_width = 2 + 2 * output_dim                    # cls | rec | app
    head_pad = _round_up(max(head_width, 128), 128)    # lane-dense output width

    # Sublane granularity of the batch tile (f32 -> 8 rows, bf16 -> 16 rows).
    sublane = 16 if jnp.dtype(compute_dtype) == jnp.dtype(jnp.bfloat16) else 8
    tb = batch_tile if batch_tile is not None else _default_batch_tile(B, sublane)
    assert B % tb == 0, "batch must be divisible by the batch tile"
    assert tb == B or tb % sublane == 0, (
        f"batch_tile must be a multiple of {sublane} (or equal to the batch)")
    grid = (B // tb,)

    # Fuse the three head weights/biases into one slab, zero-padded to head_pad lanes.
    wh = jnp.concatenate([params["wc"], params["wr"], params["wa"]], axis=1)
    wh = jnp.pad(wh, ((0, 0), (0, head_pad - head_width)))
    bh = jnp.concatenate([params["bc"], params["br"], params["ba"]], axis=1)
    bh = jnp.pad(bh, ((0, 0), (0, head_pad - head_width)))

    # bf16 MXU operands (halves x/weight DMA bytes); biases + accumulation stay f32.
    x_c = x.astype(compute_dtype)
    w1_c = params["w1"].astype(compute_dtype)
    wh_c = wh.astype(compute_dtype)
    b1_f = params["b1"].astype(jnp.float32)
    bh_f = bh.astype(jnp.float32)

    # Grid-invariant operands (weights/biases): single-buffered, since their
    # index_map is constant across the grid -- no point double-buffering them.
    def resident(shape):
        return pl.BlockSpec(shape, lambda i: (0, 0), pipeline_mode=pl.Buffered(1))

    itemsize = jnp.dtype(compute_dtype).itemsize
    cost = pl.CostEstimate(
        flops=2 * B * input_dim * hidden_dim + 2 * B * hidden_dim * head_pad,
        transcendentals=0,
        bytes_accessed=(B * input_dim + input_dim * hidden_dim
                        + hidden_dim * head_pad) * itemsize
                       + (hidden_dim + head_pad + B * head_pad) * 4,
    )

    # NOTE: for very large hidden_dim/output_dim (v7x has only 64 MiB VMEM) the
    # weight slabs should be tiled along hidden_dim with a pl.when-initialized
    # f32 accumulator instead of being kept fully resident; unnecessary here.
    out = pl.pallas_call(
        mlp3out_kernel,
        out_shape=jax.ShapeDtypeStruct((B, head_pad), x.dtype),
        grid_spec=pltpu.PrefetchScalarGridSpec(
            num_scalar_prefetch=0,
            grid=grid,
            in_specs=[
                pl.BlockSpec((tb, input_dim), lambda i: (i, 0)),  # x tile (pipelined)
                resident((input_dim, hidden_dim)),                # W1
                resident((1, hidden_dim)),                        # b1
                resident((hidden_dim, head_pad)),                 # Wc|Wr|Wa (padded)
                resident((1, head_pad)),                          # bc|br|ba (padded)
            ],
            out_specs=pl.BlockSpec((tb, head_pad), lambda i: (i, 0)),
        ),
        compiler_params=pltpu.CompilerParams(
            dimension_semantics=("parallel",),
            vmem_limit_bytes=48 * 1024 * 1024,
        ),
        cost_estimate=cost,
    )(x_c, w1_c, b1_f, wh_c, bh_f)

    out_cls = out[:, :2]
    out_rec = out[:, 2:2 + output_dim]
    out_app = out[:, 2 + output_dim:2 + 2 * output_dim]
    return out_cls, out_rec, out_app


def init_params(key, input_dim, hidden_dim, output_dim):
    """Deterministic PyTorch-Linear-style init (U[-1/sqrt(fan_in), 1/sqrt(fan_in)]).
    Weights are stored transposed: [in_features, out_features]."""
    ks = jax.random.split(key, 8)

    def linear(kw, kb, fan_in, fan_out):
        bound = 1.0 / jnp.sqrt(fan_in)
        w = jax.random.uniform(kw, (fan_in, fan_out), jnp.float32, -bound, bound)
        b = jax.random.uniform(kb, (1, fan_out), jnp.float32, -bound, bound)
        return w, b

    w1, b1 = linear(ks[0], ks[1], input_dim, hidden_dim)
    wc, bc = linear(ks[2], ks[3], hidden_dim, 2)
    wr, br = linear(ks[4], ks[5], hidden_dim, output_dim)
    wa, ba = linear(ks[6], ks[7], hidden_dim, output_dim)
    # fc2 is defined in the PyTorch module but never used in forward -> omitted.
    return dict(w1=w1, b1=b1, wc=wc, bc=bc, wr=wr, br=br, wa=wa, ba=ba)


def mlp3out_ref(x, p):
    h = jnp.maximum(x @ p["w1"] + p["b1"], 0.0)
    return (h @ p["wc"] + p["bc"], h @ p["wr"] + p["br"], h @ p["wa"] + p["ba"])


if __name__ == "__main__":
    key = jax.random.PRNGKey(0)
    kx, kp = jax.random.split(key)

    B, input_dim, hidden_dim, output_dim = 256, 32, 64, 16
    x = jax.random.normal(kx, (B, input_dim), jnp.float32)
    params = init_params(kp, input_dim, hidden_dim, output_dim)

    # Default batch tile -> 128 rows (multiple of 16 sublanes), grid = (2,).
    out_cls, out_rec, out_app = mlp3out_forward(x, params)
    jax.block_until_ready((out_cls, out_rec, out_app))

    ref_cls, ref_rec, ref_app = mlp3out_ref(x, params)
    assert out_cls.shape == (B, 2)
    assert out_rec.shape == (B, output_dim)
    assert out_app.shape == (B, output_dim)
    # bf16 MXU operands with f32 accumulation -> loosened tolerance vs f32 ref.
    assert jnp.allclose(out_cls, ref_cls, atol=5e-2, rtol=5e-2)
    assert jnp.allclose(out_rec, ref_rec, atol=5e-2, rtol=5e-2)
    assert jnp.allclose(out_app, ref_app, atol=5e-2, rtol=5e-2)

    print("KERNEL_OK")
</pallas_src>

<mosaic_0001>
module attributes {stable_mosaic.version = 11 : i64} {
  func.func @mlp3out_kernel(%arg0: i32, %arg1: memref<128x32xbf16, #tpu.memory_space<vmem>>, %arg2: memref<32x64xbf16, #tpu.memory_space<vmem>>, %arg3: memref<1x64xf32, #tpu.memory_space<vmem>>, %arg4: memref<64x128xbf16, #tpu.memory_space<vmem>>, %arg5: memref<1x128xf32, #tpu.memory_space<vmem>>, %arg6: memref<128x128xf32, #tpu.memory_space<vmem>>) attributes {dimension_semantics = [#tpu.dimension_semantics<parallel>], iteration_bounds = array<i64: 2>, scalar_prefetch = 0 : i64, scratch_operands = 0 : i64, tpu.core_type = #tpu.core_type<tc>, window_params = [{transform_indices = @transform_0, window_bounds = array<i64: 128, 32>}, {pipeline_mode = #tpu.pipeline_mode<synchronous>, transform_indices = @transform_1, window_bounds = array<i64: 32, 64>}, {pipeline_mode = #tpu.pipeline_mode<synchronous>, transform_indices = @transform_2, window_bounds = array<i64: 1, 64>}, {pipeline_mode = #tpu.pipeline_mode<synchronous>, transform_indices = @transform_3, window_bounds = array<i64: 64, 128>}, {pipeline_mode = #tpu.pipeline_mode<synchronous>, transform_indices = @transform_4, window_bounds = array<i64: 1, 128>}, {transform_indices = @transform_5, window_bounds = array<i64: 128, 128>}]} {
    %c0 = arith.constant 0 : index
    %c0_0 = arith.constant 0 : index
    %0 = vector.load %arg1[%c0, %c0_0] : memref<128x32xbf16, #tpu.memory_space<vmem>>, vector<128x32xbf16>
    %c0_1 = arith.constant 0 : index
    %c0_2 = arith.constant 0 : index
    %1 = vector.load %arg2[%c0_1, %c0_2] : memref<32x64xbf16, #tpu.memory_space<vmem>>, vector<32x64xbf16>
    %cst = arith.constant dense<0.000000e+00> : vector<128x64xf32>
    %2 = tpu.matmul %0, %1, %cst {dimension_numbers = #tpu.dot_dimension_numbers<[1], [0], [0], [1], [0, 0, 1, 1], [], []>} : vector<128x32xbf16>, vector<32x64xbf16>, vector<128x64xf32> -> vector<128x64xf32>
    %c0_3 = arith.constant 0 : index
    %c0_4 = arith.constant 0 : index
    %3 = vector.load %arg3[%c0_3, %c0_4] : memref<1x64xf32, #tpu.memory_space<vmem>>, vector<1x64xf32>
    %4 = vector.broadcast %3 : vector<1x64xf32> to vector<128x64xf32>
    %5 = arith.addf %2, %4 : vector<128x64xf32>
    %cst_5 = arith.constant 0.000000e+00 : f32
    %6 = vector.broadcast %cst_5 : f32 to vector<128x64xf32>
    %7 = arith.maximumf %5, %6 : vector<128x64xf32>
    %8 = arith.truncf %7 : vector<128x64xf32> to vector<128x64xbf16>
    %c0_6 = arith.constant 0 : index
    %c0_7 = arith.constant 0 : index
    %9 = vector.load %arg4[%c0_6, %c0_7] : memref<64x128xbf16, #tpu.memory_space<vmem>>, vector<64x128xbf16>
    %cst_8 = arith.constant dense<0.000000e+00> : vector<128x128xf32>
    %10 = tpu.matmul %8, %9, %cst_8 {dimension_numbers = #tpu.dot_dimension_numbers<[1], [0], [0], [1], [0, 0, 1, 1], [], []>} : vector<128x64xbf16>, vector<64x128xbf16>, vector<128x128xf32> -> vector<128x128xf32>
    %c0_9 = arith.constant 0 : index
    %c0_10 = arith.constant 0 : index
    %11 = vector.load %arg5[%c0_9, %c0_10] : memref<1x128xf32, #tpu.memory_space<vmem>>, vector<1x128xf32>
    %12 = vector.broadcast %11 : vector<1x128xf32> to vector<128x128xf32>
    %13 = arith.addf %10, %12 : vector<128x128xf32>
    %c0_11 = arith.constant 0 : index
    %c0_12 = arith.constant 0 : index
    %14 = vector.load %arg6[%c0_11, %c0_12] : memref<128x128xf32, #tpu.memory_space<vmem>>, vector<128x128xf32>
    tpu.vector_store %arg6[%c0_11, %c0_12], %13 {strides = array<i32>} : memref<128x128xf32, #tpu.memory_space<vmem>>, vector<128x128xf32>,
    return
  }
  func.func @transform_0(%arg0: i32) -> (i32, i32) {
    %c0_i32 = arith.constant 0 : i32
    %c0_i32_0 = arith.constant 0 : i32
    return %arg0, %c0_i32 : i32, i32
  }
  func.func @transform_1(%arg0: i32) -> (i32, i32) {
    %c0_i32 = arith.constant 0 : i32
    %c0_i32_0 = arith.constant 0 : i32
    %c0_i32_1 = arith.constant 0 : i32
    return %c0_i32, %c0_i32_0 : i32, i32
  }
  func.func @transform_2(%arg0: i32) -> (i32, i32) {
    %c0_i32 = arith.constant 0 : i32
    %c0_i32_0 = arith.constant 0 : i32
    %c0_i32_1 = arith.constant 0 : i32
    return %c0_i32, %c0_i32_0 : i32, i32
  }
  func.func @transform_3(%arg0: i32) -> (i32, i32) {
    %c0_i32 = arith.constant 0 : i32
    %c0_i32_0 = arith.constant 0 : i32
    %c0_i32_1 = arith.constant 0 : i32
    return %c0_i32, %c0_i32_0 : i32, i32
  }
  func.func @transform_4(%arg0: i32) -> (i32, i32) {
    %c0_i32 = arith.constant 0 : i32
    %c0_i32_0 = arith.constant 0 : i32
    %c0_i32_1 = arith.constant 0 : i32
    return %c0_i32, %c0_i32_0 : i32, i32
  }
  func.func @transform_5(%arg0: i32) -> (i32, i32) {
    %c0_i32 = arith.constant 0 : i32
    %c0_i32_0 = arith.constant 0 : i32
    return %arg0, %c0_i32 : i32, i32
  }
}

</mosaic_0001>

<bundles_post_ra>
// kernel: tpu_custom_call.1
= control target key start
LH: loop header
LB: loop body
LE: loop exit
PB: predicated region body
PF: predicated region fallthrough
CT: control target
= control target key end

     0   :  { %10 = vsyncpa [#allocation3], 0  ;;  %s1130_s0 = inlined_call_operand.vmem [shape: bf16[256,32], index: 0, kind: input, shape index: {}]   ;;  %s1131_s1 = inlined_call_operand.vmem [shape: bf16[32,64], index: 1, kind: input, shape index: {}]   ;;  %s1132_s2 = inlined_call_operand.vmem [shape: f32[1,64], index: 2, kind: input, shape index: {}]   ;;  %s1133_s3 = inlined_call_operand.vmem [shape: bf16[64,128], index: 3, kind: input, shape index: {}]   ;;  %s1134_s4 = inlined_call_operand.vmem [shape: f32[1,128], index: 4, kind: input, shape index: {}]   ;;  %s1135_s5 = inlined_call_operand.hbm [shape: f32[256,128], index: 5, kind: output, shape index: {}]  }
   0x1   :  { %12 = vsyncpa [#allocation3 + $0x1], 0  ;;  %s966_s18 = smov 0   ;;  %s968_s19 = smov 0  }
   0x2   :  { %s970_s20 = smov 0   ;;  %s972_s21 = smov 0  }
   0x3 LB: > { %s987_s22 = sadd.s32 4294967295, %s931_s21   ;;  %s705_s23 = sadd.s32 4294967294, %s931_s21   ;;  %s931_s21 = sphi %s972_s21, %s1141_s21   ;;  %s927_s20 = sphi %s970_s20, %s1140_s20   ;;  %s923_s19 = sphi %s968_s19, %s1139_s19   ;;  %s919_s18 = sphi %s966_s18, %s1138_s18  }
   0x4   : > { %s991_s24 = sadd.s32 1, %s931_s21   ;;  %s135_s25 = sadd.s32 1, %s927_s20 }
   0x5   : > { %s132_s26 = ssub.s32 %s931_s21, %s991_s24  ;;  %p145_p0 = scmp.ne.s32.totalorder %s927_s20, %s923_s19 }
   0x6   : > { %p133_p1 = scmp.eq.s32.totalorder %s132_s26, 0  ;;  %p146_p2 = scmp.eq.s32.totalorder %s987_s22, 1 }
   0x7   : > { %p151_p3 = scmp.ne.s32.totalorder %s923_s19, %s919_s18  ;;  %p152_p4 = scmp.eq.s32.totalorder %s705_s23, 1 }
   0x8   : > { %s1002_s27 = scalar_select %p133_p1, %s927_s20, %s135_s25  }
   0x9   : > { %p1004_p5 = por %p146_p2, %p145_p0  ;;  %p1008_p6 = por %p152_p4, %p151_p3 }
   0xa   : > { %p708_p7 = scmp.ge.s32.totalorder %s931_s21, 1  ;;  %p191_p8 = scmp.lt.s32.totalorder %s931_s21, 3 }
   0xc   : > { %p192_p9 = pnand %p708_p7, %p191_p8 }
   0xd   : > { %s710_s7 = sshll.u32 (!%p192_p9), %s987_s22, 4  ;;  %s216_s8 = sand.u32 (!%p192_p9), 1, %s923_s19  }
   0xe   : > { %195 = sbr.rel (%p192_p9) target bundleno = 473 (0x1d9), region = 40  ;;  %p220_p10 = scmp.lt.s32.totalorder (!%p192_p9), %s710_s7, 31 }
   0xf   : > { %s709_s9 = sshll.u32 (!%p192_p9), %s216_s8, 7  ;;  %s749_s13 = sshll.u32 (!%p192_p9), %s987_s22, 11 }
  0x10   : > { %s1082_s17 = scalar_lea.hbm (!%p192_p9), %s1135_s5, %s749_s13  ;;  %s1090_s22 = scalar_lea.sflag (!%p192_p9), [#allocation3], %s216_s8 }
  0x11   : > { %s933_s25 = smov (!%p192_p9), [#allocation2]  }
  0x12   : > { %s875_s26 = sshll.u32 (!%p192_p9), %s933_s25, 4  ;;  %s876_s26 = int_to_ptr.vmem [resolvable:$false] %s875_s26 }
  0x13   : > { %v857_v0 = vld [vmem:[%s1131_s1 + $0x8] sm:$0xff]   ;;  %v858_v1 = vld [vmem:[%s1131_s1] sm:$0xff]   ;;  %v867_v2 = vld [vmem:[%s1133_s3 + $0x18] sm:$0xff]   ;;  %s1143_s7 = smov (!%p220_p10, %s710_s7), 31  ;;  %vm306_vm0 = vcmask 261120   ;;  %vm491_vm1 = vcmask 523264  }
  0x14   : > { %772 = vmatprep.subr.bf16.mxu0 %v857_v0  ;;  %792 = vmatprep.subr.bf16.mxu1 %v867_v2  ;;  %s711_s12 = sshll.u32 %s1143_s7, 2  ;;  %v868_v11 = vld [vmem:[%s1133_s3 + $0x10] sm:$0xff]   ;;  %v869_v12 = vld [vmem:[%s1133_s3 + $0x8] sm:$0xff]   ;;  %v870_v13 = vld [vmem:[%s1133_s3] sm:$0xff]   ;;  %s877_s30 = scalar_lea.vmem %s876_s26, 4096 }
  0x15   : > { %773 = vmatpush3.bf16.msra.mxu0 %v857_v0  ;;  %793 = vmatpush3.bf16.msra.mxu1 %v867_v2  ;;  %s223_s15 = scalar_lea.vmem %s1130_s0, %s711_s12  ;;  %v712_v16 = vld [vmem:[%s1132_s2] ss:$0 sm:$0xff]  ;;  %s1061_s12 = scalar_lea.vmem [#allocation2], %s709_s9 }
  0x16   : > { %774 = vmatprep.subr.bf16.mxu0 %v858_v1  ;;  %v859_v3 = vld [vmem:[%s223_s15] sm:$0xff]   ;;  %v860_v4 = vld [vmem:[%s223_s15 + $0x8] sm:$0xff]   ;;  %v861_v5 = vld [vmem:[%s223_s15 + $0x10] sm:$0xff]   ;;  %794 = vmatprep.subr.bf16.mxu1 %v868_v11  ;;  %s643_s14 = sshll.u32 %s1061_s12, 4  ;;  %s1084_s14 = int_to_ptr.vmem [resolvable:$true] %s643_s14 }
  0x17   : > { %776 = vmatprep.mubr.msk.bf16.mxu0 %vm306_vm0, %v859_v3  ;;  %v862_v6 = vld [vmem:[%s223_s15 + $0x18] sm:$0xff]   ;;  %v863_v7 = vld [vmem:[%s223_s15 + $0x20] sm:$0xff]   ;;  %v864_v8 = vld [vmem:[%s223_s15 + $0x28] sm:$0xff]   ;;  %s871_s23 = scalar_lea.vmem %s1084_s14, 2048  ;;  %p878_p0 = scmp.lt.s32.totalorder %s1084_s14, %s876_s26 }
  0x18   : > { %v865_v9 = vld [vmem:[%s223_s15 + $0x30] sm:$0xff]   ;;  %v866_v10 = vld [vmem:[%s223_s15 + $0x38] sm:$0xff]   ;;  %p872_p11 = scmp.ne.s32.totalorder %s1084_s14, %s871_s23  ;;  %p879_p1 = scmp.lt.s32.totalorder %s877_s30, %s871_s23 }
  0x19   : > { %775 = vmatpush3.bf16.msra.mxu0 %v858_v1  ;;  %795 = vmatpush3.bf16.msra.mxu1 %v868_v11 }
  0x1a   : > { %796 = vmatprep.subr.bf16.mxu1 %v869_v12  ;;  %p873_p12 = pnand %p872_p11, %p1004_p5  ;;  %p880_p2 = por %p879_p1, %p878_p0 }
  0x1c   : > { %777 = vmatmul.mubr.msk.bf16.vlgmr.msra.gmra.mxu0 %vm306_vm0, %v860_v4  ;;  %p874_p13 = pneg %p873_p12 }
  0x1d   : > { %780 = vmatprep.mubr.msk.bf16.mxu0 %vm306_vm0, %v861_v5  ;;  %797 = vmatpush3.bf16.msra.mxu1 %v869_v12 }
  0x1e   : > { %798 = vmatprep.subr.bf16.mxu1 %v870_v13  ;;  %p881_p3 = pnand %p880_p2, %p874_p13 }
  0x21   : > { %799 = vmatpush3.bf16.msra.mxu1 %v870_v13 }
  0x24   : > { %781 = vmatmul.mubr.msk.bf16.gmra.mxu0 %vm306_vm0, %v862_v6 }
  0x25   : > { %784 = vmatprep.mubr.msk.bf16.mxu0 %vm306_vm0, %v863_v7  ;;  %v731_v7 = vld [vmem:[%s1134_s4] ss:$0 sm:$0xff] }
  0x2c   : > { %785 = vmatmul.mubr.msk.bf16.gmra.mxu0 %vm306_vm0, %v864_v8 }
  0x2d   : > { %788 = vmatprep.mubr.msk.bf16.mxu0 %vm306_vm0, %v865_v9 }
  0x34   : > { %789 = vmatmul.mubr.msk.bf16.gmra.mxu0 %vm306_vm0, %v866_v10 }
  0xdc   : > { %v778_v14 = vpop.f32.mrf.mxu0 }
  0xdd   : > { %v374_v20 = vadd.f32 %v778_v14, %v712_v16 }
  0xde   : > { %v365_v15 = vpop.f32.mrf.mxu0 }
  0xdf   : > { %v366_v18 = vadd.f32 %v712_v16, %v365_v15  ;;  %v430_v27 = vmax.f32 %v374_v20, 0.0 }
  0xe0   : > { %v779_v17 = vpop.f32.mrf.mxu0 }
  0xe1   : > { %v377_v19 = vadd.f32 %v779_v17, %v712_v16  ;;  %v428_v25 = vmax.f32 %v366_v18, 0.0 }
  0xe2   : > { %v368_v21 = vpop.f32.mrf.mxu0 }
  0xe3   : > { %v369_v22 = vadd.f32 %v712_v16, %v368_v21  ;;  %v431_v23 = vmax.f32 %v377_v19, 0.0 }
  0xe4   : > { %v782_v24 = vpop.f32.mrf.mxu0 }
  0xe5   : > { %v429_v26 = vmax.f32 %v369_v22, 0.0  ;;  %v445_v30 = vpack.c.bf16 %v431_v23, %v430_v27  ;;  %v390_v34 = vadd.f32 %v782_v24, %v712_v16 }
  0xe6   : > { %v381_v28 = vpop.f32.mrf.mxu0 }
  0xe7   : > { %v444_v29 = vpack.c.bf16 %v429_v26, %v428_v25  ;;  %v382_v32 = vadd.f32 %v712_v16, %v381_v28  ;;  %v434_v41 = vmax.f32 %v390_v34, 0.0 }
  0xe8   : > { %v783_v31 = vpop.f32.mrf.mxu0 }
  0xe9   : > { %v393_v33 = vadd.f32 %v783_v31, %v712_v16  ;;  %800 = vmatprep.mubr.msk.bf16.mxu1 %vm491_vm1, %v444_v29  ;;  %v432_v39 = vmax.f32 %v382_v32, 0.0 }
  0xea   : > { %v384_v35 = vpop.f32.mrf.mxu0  ;;  %801 = vmatmul.mubr.msk.bf16.vlgmr.msra.gmra.mxu1 %vm491_vm1, %v445_v30 }
  0xeb   : > { %v385_v36 = vadd.f32 %v712_v16, %v384_v35  ;;  %v435_v37 = vmax.f32 %v393_v33, 0.0 }
  0xec   : > { %v786_v38 = vpop.f32.mrf.mxu0 }
  0xed   : > { %v433_v40 = vmax.f32 %v385_v36, 0.0  ;;  %v447_v44 = vpack.c.bf16 %v435_v37, %v434_v41  ;;  %v406_v48 = vadd.f32 %v786_v38, %v712_v16 }
  0xee   : > { %v397_v42 = vpop.f32.mrf.mxu0 }
  0xef   : > { %v446_v43 = vpack.c.bf16 %v433_v40, %v432_v39  ;;  %v398_v46 = vadd.f32 %v712_v16, %v397_v42  ;;  %v438_v55 = vmax.f32 %v406_v48, 0.0 }
  0xf0   : > { %v787_v45 = vpop.f32.mrf.mxu0 }
  0xf1   : > { %v409_v47 = vadd.f32 %v787_v45, %v712_v16  ;;  %804 = vmatprep.mubr.msk.bf16.mxu1 %vm491_vm1, %v446_v43  ;;  %v436_v53 = vmax.f32 %v398_v46, 0.0 }
  0xf2   : > { %v400_v49 = vpop.f32.mrf.mxu0  ;;  %805 = vmatmul.mubr.msk.bf16.gmra.mxu1 %vm491_vm1, %v447_v44 }
  0xf3   : > { %v401_v50 = vadd.f32 %v712_v16, %v400_v49  ;;  %v439_v51 = vmax.f32 %v409_v47, 0.0 }
  0xf4   : > { %v790_v52 = vpop.f32.mrf.mxu0 }
  0xf5   : > { %v437_v54 = vmax.f32 %v401_v50, 0.0  ;;  %v449_v58 = vpack.c.bf16 %v439_v51, %v438_v55  ;;  %v422_v62 = vadd.f32 %v790_v52, %v712_v16 }
  0xf6   : > { %v413_v56 = vpop.f32.mrf.mxu0 }
  0xf7   : > { %v448_v57 = vpack.c.bf16 %v437_v54, %v436_v53  ;;  %v414_v60 = vadd.f32 %v712_v16, %v413_v56  ;;  %v442_v4 = vmax.f32 %v422_v62, 0.0 }
  0xf8   : > { %v791_v59 = vpop.f32.mrf.mxu0 }
  0xf9   : > { %v425_v61 = vadd.f32 %v791_v59, %v712_v16  ;;  %808 = vmatprep.mubr.msk.bf16.mxu1 %vm491_vm1, %v448_v57  ;;  %v440_v2 = vmax.f32 %v414_v60, 0.0 }
  0xfa   : > { %v416_v63 = vpop.f32.mrf.mxu0  ;;  %809 = vmatmul.mubr.msk.bf16.gmra.mxu1 %vm491_vm1, %v449_v58 }
  0xfb   : > { %v417_v0 = vadd.f32 %v712_v16, %v416_v63  ;;  %v443_v1 = vmax.f32 %v425_v61, 0.0 }
  0xfd   : > { %v441_v3 = vmax.f32 %v417_v0, 0.0  ;;  %v451_v6 = vpack.c.bf16 %v443_v1, %v442_v4 }
  0xff   : > { %v450_v5 = vpack.c.bf16 %v441_v3, %v440_v2 }
 0x101   : > { %812 = vmatprep.mubr.msk.bf16.mxu1 %vm491_vm1, %v450_v5 }
 0x102   : > { %813 = vmatmul.mubr.msk.bf16.gmra.mxu1 %vm491_vm1, %v451_v6 }
 0x1aa   : > { %v802_v8 = vpop.f32.mrf.mxu1 }
 0x1ab   : > { %v559_v9 = vadd.f32 %v802_v8, %v731_v7 }
 0x1ac   : > { %v550_v10 = vpop.f32.mrf.mxu1 }
 0x1ad   : > { %615 = vst [vmem:[%s1061_s12 + $0x10] sm:$0xff] %v559_v9  ;;  %v551_v11 = vadd.f32 %v731_v7, %v550_v10 }
 0x1ae   : > { %v803_v12 = vpop.f32.mrf.mxu1 }
 0x1af   : > { %613 = vst [vmem:[%s1061_s12] sm:$0xff] %v551_v11  ;;  %v562_v13 = vadd.f32 %v803_v12, %v731_v7 }
 0x1b0   : > { %v553_v14 = vpop.f32.mrf.mxu1 }
 0x1b1   : > { %616 = vst [vmem:[%s1061_s12 + $0x18] sm:$0xff] %v562_v13  ;;  %v554_v15 = vadd.f32 %v731_v7, %v553_v14 }
 0x1b2   : > { %v806_v16 = vpop.f32.mrf.mxu1 }
 0x1b3   : > { %614 = vst [vmem:[%s1061_s12 + $0x8] sm:$0xff] %v554_v15  ;;  %v575_v17 = vadd.f32 %v806_v16, %v731_v7 }
 0x1b4   : > { %v566_v18 = vpop.f32.mrf.mxu1 }
 0x1b5   : > { %619 = vst [vmem:[%s1061_s12 + $0x30] sm:$0xff] %v575_v17  ;;  %v567_v19 = vadd.f32 %v731_v7, %v566_v18 }
 0x1b6   : > { %v807_v20 = vpop.f32.mrf.mxu1 }
 0x1b7   : > { %617 = vst [vmem:[%s1061_s12 + $0x20] sm:$0xff] %v567_v19  ;;  %v578_v21 = vadd.f32 %v807_v20, %v731_v7 }
 0x1b8   : > { %v569_v22 = vpop.f32.mrf.mxu1 }
 0x1b9   : > { %620 = vst [vmem:[%s1061_s12 + $0x38] sm:$0xff] %v578_v21  ;;  %v570_v23 = vadd.f32 %v731_v7, %v569_v22 }
 0x1ba   : > { %v810_v24 = vpop.f32.mrf.mxu1 }
 0x1bb   : > { %618 = vst [vmem:[%s1061_s12 + $0x28] sm:$0xff] %v570_v23  ;;  %v591_v25 = vadd.f32 %v810_v24, %v731_v7 }
 0x1bc   : > { %v582_v26 = vpop.f32.mrf.mxu1 }
 0x1bd   : > { %623 = vst [vmem:[%s1061_s12 + $0x50] sm:$0xff] %v591_v25  ;;  %v583_v27 = vadd.f32 %v731_v7, %v582_v26 }
 0x1be   : > { %v811_v28 = vpop.f32.mrf.mxu1 }
 0x1bf   : > { %621 = vst [vmem:[%s1061_s12 + $0x40] sm:$0xff] %v583_v27  ;;  %v594_v29 = vadd.f32 %v811_v28, %v731_v7 }
 0x1c0   : > { %v585_v30 = vpop.f32.mrf.mxu1 }
 0x1c1   : > { %624 = vst [vmem:[%s1061_s12 + $0x58] sm:$0xff] %v594_v29  ;;  %v586_v31 = vadd.f32 %v731_v7, %v585_v30 }
 0x1c2   : > { %v814_v32 = vpop.f32.mrf.mxu1 }
 0x1c3   : > { %622 = vst [vmem:[%s1061_s12 + $0x48] sm:$0xff] %v586_v31  ;;  %v607_v33 = vadd.f32 %v814_v32, %v731_v7 }
 0x1c4   : > { %v598_v34 = vpop.f32.mrf.mxu1 }
 0x1c5   : > { %627 = vst [vmem:[%s1061_s12 + $0x70] sm:$0xff] %v607_v33  ;;  %v599_v35 = vadd.f32 %v731_v7, %v598_v34 }
 0x1c6   : > { %v815_v36 = vpop.f32.mrf.mxu1 }
 0x1c7   : > { %625 = vst [vmem:[%s1061_s12 + $0x60] sm:$0xff] %v599_v35  ;;  %v610_v37 = vadd.f32 %v815_v36, %v731_v7 }
 0x1c8   : > { %v601_v38 = vpop.f32.mrf.mxu1 }
 0x1c9   : > { %628 = vst [vmem:[%s1061_s12 + $0x78] sm:$0xff] %v610_v37  ;;  %v602_v39 = vadd.f32 %v731_v7, %v601_v38 }
 0x1cb   : > { %626 = vst [vmem:[%s1061_s12 + $0x68] sm:$0xff] %v602_v39 }
 0x1cc   : > { %884 = shalt.err (!%p881_p3)
}
 0x1cd   : > { %s885_s6 = scalar_lea.hbm %s1082_s17, 2048  ;;  %s889_s9 = scalar_lea.hbm %s1135_s5, 4096 }
 0x1ce   : > { %p886_p4 = scmp.ne.s32.totalorder %s1082_s17, %s885_s6  ;;  %p890_p9 = scmp.lt.s32.totalorder %s1082_s17, %s1135_s5 }
 0x1cf   : > { %p891_p10 = scmp.lt.s32.totalorder %s889_s9, %s885_s6 }
 0x1d0   : > { %p887_p7 = pnand %p886_p4, %p1004_p5 }
 0x1d1   : > { %p892_p11 = por %p891_p10, %p890_p9 }
 0x1d2   : > { %p888_p8 = pneg %p887_p7 }
 0x1d4   : > { %p893_p12 = pnand %p892_p11, %p888_p8 }
 0x1d6   : > { %896 = shalt.err (!%p893_p12)
}
 0x1d7   : > { %s934_s12 = smov 128   ;;  %s935_s13 = smov 8  }
 0x1d8   : > { %816 = dma.vmem_to_hbm [thread:$0]  (%p1004_p5), %s1084_s14, 2048, %s1082_s17, %s1090_s22, %s934_s12, %s934_s12, %s935_s13  }
 0x1d9 PF: > { %p822_p13 = scmp.ge.s32.totalorder %s931_s21, 2  ;;  %s658_s15 = sand.u32 1, %s919_s18  }
 0x1da   : > { %s659_s16 = scalar_lea.sflag [#allocation3], %s658_s15 }
 0x1db   : > { %p819_p0 = pnand %p822_p13, %p1008_p6 }
 0x1dd   : > { %p820_p1 = pneg %p819_p0 }
 0x1df   : > { %914 = dma.done.wait (%p820_p1), %s659_s16, 2048  }
 0x1e0   : > { %916 = vsyncadd (%p820_p1), %s659_s16, 4294965248  ;;  %p15_p2 = scmp.ge.s32.totalorder %s991_s24, 4   ;;  %s1138_s18 = smov %s923_s19 }
 0x1e1   : > { %s1139_s19 = smov %s927_s20  ;;  %s1140_s20 = smov %s1002_s27 }
 0x1e2   : > { %s1141_s21 = smov %s991_s24  ;;  %17 = sbr.rel (!%p15_p2) target bundleno = 3 (0x3), region = 75 }
 0x1e7   :  { %664 = vsyncpa [#allocation3], 1 }
 0x1e8   :  { %666 = vsyncpa [#allocation3 + $0x1], 1 }

</bundles_post_ra>
